<compile_context>
chip_gen: v5e
topology: v5e:2x2
jax: 0.10.0
libtpu: 0.0.40
codegen_flags: <defaults>
</compile_context>

<pallas_src>
import math
import functools

import jax
import jax.numpy as jnp
from jax.experimental import pallas as pl
from jax.experimental.pallas import tpu as pltpu


# ----------------------------- kernels ------------------------------------ #

def _posenc_eval_kernel(x_ref, pe_ref, o_ref):
    # x_ref: (tb, ts, D) block; pe_ref: (ts, D), already in x's dtype.
    o_ref[...] = x_ref[...] + pe_ref[...][None, :, :]


def _posenc_train_kernel(x_ref, pe_ref, bits_ref, o_ref, *, threshold, scale):
    # Dropout: keep elements whose uniform uint32 bits are >= threshold
    # (P(keep) = 1 - p); kept values are scaled by 1/(1-p).
    y = x_ref[...] + pe_ref[...][None, :, :]
    keep = bits_ref[...] >= jnp.uint32(threshold)
    scaled = y * jnp.asarray(scale, dtype=y.dtype)
    o_ref[...] = jnp.where(keep, scaled, jnp.zeros_like(scaled))


# ----------------------------- helpers ------------------------------------ #

def make_sinusoidal_table(max_len, d_model, dtype=jnp.float32):
    """Same construction as the PyTorch __init__ (shape (max_len, d_model))."""
    position = jnp.arange(max_len, dtype=jnp.float32)[:, None]
    div_term = jnp.exp(
        jnp.arange(0, d_model, 2, dtype=jnp.float32) * (-math.log(10000.0) / d_model)
    )
    pe = jnp.zeros((max_len, d_model), jnp.float32)
    pe = pe.at[:, 0::2].set(jnp.sin(position * div_term))
    pe = pe.at[:, 1::2].set(jnp.cos(position * div_term))
    return pe.astype(dtype)


def _choose_tiles(B, S, D, itemsize):
    """Pick (batch_tile, seq_tile) so one x block stays around <= ~2 MiB."""
    target = 2 * 1024 * 1024
    ts = S
    if S * D * itemsize > target:
        for cand in (2048, 1024, 512, 256, 128, 64, 32, 16, 8):
            if S % cand == 0 and cand * D * itemsize <= target:
                ts = cand
                break
    # Fold the whole batch into one block for tiny workloads (single grid step).
    tb = B if (ts == S and B * S * D * itemsize <= target) else 1
    return tb, ts


# ----------------------------- wrapper ------------------------------------ #

def positional_encoding(x, pe_table, *, p=0.1, training=False, rng_key=None):
    """x: (B, S, D);  pe_table: (max_len, D) with max_len >= S."""
    B, S, D = x.shape
    pe_s = pe_table[:S].astype(x.dtype)          # (S, D), pre-cast to x dtype
    out_shape = jax.ShapeDtypeStruct(x.shape, x.dtype)

    tb, ts = _choose_tiles(B, S, D, jnp.dtype(x.dtype).itemsize)
    grid = (S // ts, B // tb)                    # batch innermost: pe tile stays resident

    x_spec = pl.BlockSpec((tb, ts, D), lambda s, b: (b, s, 0))
    pe_spec = pl.BlockSpec((ts, D), lambda s, b: (s, 0))
    o_spec = pl.BlockSpec((tb, ts, D), lambda s, b: (b, s, 0))
    cparams = pltpu.CompilerParams(
        dimension_semantics=("parallel", "parallel"),
        vmem_limit_bytes=48 * 1024 * 1024,
    )

    use_dropout = training and p > 0.0
    if use_dropout and p >= 1.0:
        # PyTorch nn.Dropout(p=1.0) zeroes everything in training mode.
        return jnp.zeros_like(x)

    if not use_dropout:
        return pl.pallas_call(
            _posenc_eval_kernel,
            out_shape=out_shape,
            grid=grid,
            in_specs=[x_spec, pe_spec],
            out_specs=o_spec,
            compiler_params=cparams,
        )(x, pe_s)

    # Training with 0 < p < 1: integer-threshold dropout on streamed uint32 bits.
    if rng_key is None:
        rng_key = jax.random.PRNGKey(0)
    bits = jax.random.bits(rng_key, shape=x.shape, dtype=jnp.uint32)
    threshold = min(int(round(p * 2.0 ** 32)), 2 ** 32 - 1)
    scale = 1.0 / (1.0 - p)
    kernel = functools.partial(_posenc_train_kernel, threshold=threshold, scale=scale)

    return pl.pallas_call(
        kernel,
        out_shape=out_shape,
        grid=grid,
        in_specs=[x_spec, pe_spec, x_spec],      # bits share x's blocking
        out_specs=o_spec,
        compiler_params=cparams,
    )(x, pe_s, bits)


# ------------------------------ main --------------------------------------- #

if __name__ == "__main__":
    key = jax.random.PRNGKey(0)
    kx, kd = jax.random.split(key)

    B, S, D = 2, 8, 32          # batch, seq, d_model
    MAX_LEN = 64                # stand-in for max_len=5000 (only first S rows used)
    P_DROP = 0.1

    x = jax.random.normal(kx, (B, S, D), dtype=jnp.float32)
    pe_table = make_sinusoidal_table(MAX_LEN, D)
    ref = x + pe_table[:S][None, :, :]

    # --- eval mode (dropout is identity): exact check against reference ---
    out_eval = jax.block_until_ready(
        positional_encoding(x, pe_table, p=P_DROP, training=False)
    )
    assert out_eval.shape == x.shape and out_eval.dtype == x.dtype
    assert jnp.allclose(out_eval, ref, atol=1e-6, rtol=1e-6), "eval-mode mismatch"

    # --- training with p=0 short-circuits to the add-only kernel ---
    out_p0 = jax.block_until_ready(
        positional_encoding(x, pe_table, p=0.0, training=True, rng_key=kd)
    )
    assert jnp.allclose(out_p0, ref, atol=1e-6, rtol=1e-6), "p=0 training mismatch"

    # --- training mode (dropout): structural checks ---
    out_train = jax.block_until_ready(
        positional_encoding(x, pe_table, p=P_DROP, training=True, rng_key=kd)
    )
    assert out_train.shape == x.shape and out_train.dtype == x.dtype
    kept = out_train != 0.0
    # kept entries must equal (x + pe) / (1 - p)
    assert jnp.allclose(
        jnp.where(kept, out_train, 0.0),
        jnp.where(kept, ref / (1.0 - P_DROP), 0.0),
        atol=1e-5, rtol=1e-5,
    ), "train-mode scaling mismatch"
    n_drop = int(jnp.sum(~kept))
    assert 0 < n_drop < B * S * D, "dropout mask degenerate"

    print("KERNEL_OK")
</pallas_src>

<mosaic_0001>
module attributes {stable_mosaic.version = 11 : i64} {
  func.func @_posenc_eval_kernel(%arg0: i32, %arg1: i32, %arg2: memref<2x8x32xf32, #tpu.memory_space<vmem>>, %arg3: memref<8x32xf32, #tpu.memory_space<vmem>>, %arg4: memref<2x8x32xf32, #tpu.memory_space<vmem>>) attributes {dimension_semantics = [#tpu.dimension_semantics<parallel>, #tpu.dimension_semantics<parallel>], iteration_bounds = array<i64: 1, 1>, scalar_prefetch = 0 : i64, scratch_operands = 0 : i64, tpu.core_type = #tpu.core_type<tc>, window_params = [{transform_indices = @transform_0, window_bounds = array<i64: 2, 8, 32>}, {transform_indices = @transform_1, window_bounds = array<i64: 8, 32>}, {transform_indices = @transform_2, window_bounds = array<i64: 2, 8, 32>}]} {
    %c0 = arith.constant 0 : index
    %c0_0 = arith.constant 0 : index
    %c0_1 = arith.constant 0 : index
    %0 = vector.load %arg2[%c0, %c0_0, %c0_1] : memref<2x8x32xf32, #tpu.memory_space<vmem>>, vector<2x8x32xf32>
    %c0_2 = arith.constant 0 : index
    %c0_3 = arith.constant 0 : index
    %1 = vector.load %arg3[%c0_2, %c0_3] : memref<8x32xf32, #tpu.memory_space<vmem>>, vector<8x32xf32>
    %2 = vector.shape_cast %1 : vector<8x32xf32> to vector<1x8x32xf32>
    %3 = vector.broadcast %2 : vector<1x8x32xf32> to vector<2x8x32xf32>
    %4 = arith.addf %0, %3 : vector<2x8x32xf32>
    %c0_4 = arith.constant 0 : index
    %c0_5 = arith.constant 0 : index
    %c0_6 = arith.constant 0 : index
    %5 = vector.load %arg4[%c0_4, %c0_5, %c0_6] : memref<2x8x32xf32, #tpu.memory_space<vmem>>, vector<2x8x32xf32>
    tpu.vector_store %arg4[%c0_4, %c0_5, %c0_6], %4 {strides = array<i32>} : memref<2x8x32xf32, #tpu.memory_space<vmem>>, vector<2x8x32xf32>,
    return
  }
  func.func @transform_0(%arg0: i32, %arg1: i32) -> (i32, i32, i32) {
    %c0_i32 = arith.constant 0 : i32
    %c0_i32_0 = arith.constant 0 : i32
    return %arg1, %arg0, %c0_i32 : i32, i32, i32
  }
  func.func @transform_1(%arg0: i32, %arg1: i32) -> (i32, i32) {
    %c0_i32 = arith.constant 0 : i32
    %c0_i32_0 = arith.constant 0 : i32
    return %arg0, %c0_i32 : i32, i32
  }
  func.func @transform_2(%arg0: i32, %arg1: i32) -> (i32, i32, i32) {
    %c0_i32 = arith.constant 0 : i32
    %c0_i32_0 = arith.constant 0 : i32
    return %arg1, %arg0, %c0_i32 : i32, i32, i32
  }
}

</mosaic_0001>

<bundles_post_ra>
// kernel: tpu_custom_call.1
= control target key start
LH: loop header
LB: loop body
LE: loop exit
PB: predicated region body
PF: predicated region fallthrough
CT: control target
= control target key end

     0   :  { %7 = vsyncpa [#allocation3], 0  ;;  %s182_s0 = inlined_call_operand.hbm [shape: f32[2,8,32], index: 0, kind: input, shape index: {}]   ;;  %s183_s1 = inlined_call_operand.hbm [shape: f32[8,32], index: 1, kind: input, shape index: {}]   ;;  %s184_s2 = inlined_call_operand.hbm [shape: f32[2,8,32], index: 2, kind: output, shape index: {}]  }
   0x1   :  { %8 = vsyncpa [#allocation6], 0 }
   0x2   :  { %9 = vsyncpa [#allocation4], 0  ;;  %s14_s11 = sshll.u32 %s182_s0, 4  ;;  %s153_s12 = smov [#allocation2]   ;;  %s15_s11 = int_to_ptr.hbm [resolvable:$true] %s14_s11 }
   0x3   :  { %s16_s13 = sshll.u32 %s153_s12, 4  ;;  %s28_s16 = sshll.u32 %s183_s1, 4  ;;  %s17_s13 = int_to_ptr.vmem [resolvable:$true] %s16_s13  ;;  %s29_s16 = int_to_ptr.hbm [resolvable:$true] %s28_s16 }
   0x4   :  { %s154_s17 = smov 128   ;;  %s155_s18 = smov 8  }
   0x5   :  { %22 = dma.hbm_to_vmem [thread:$0]  %s15_s11, 256, %s17_s13, [#allocation3], %s154_s17, %s154_s17, %s155_s18  }
   0x6   :  { %s156_s19 = smov [#allocation5]  }
   0x7   :  { %s30_s20 = sshll.u32 %s156_s19, 4  ;;  %s31_s20 = int_to_ptr.vmem [resolvable:$true] %s30_s20 }
   0x8   :  { %33 = dma.hbm_to_vmem [thread:$0]  %s29_s16, 128, %s31_s20, [#allocation6]  }
   0x9   :  { %147 = dma.done.wait [#allocation3], 256  }
   0xa   :  { %148 = vsyncadd [#allocation3], 4294967040 }
   0xb   :  { %149 = dma.done.wait [#allocation6], 128  }
   0xc   :  { %150 = vsyncadd [#allocation6], 4294967168  ;;  %s157_s0 = smov [#allocation7]   ;;  %s56_s24 = sshll.u32 %s184_s2, 4  ;;  %v42_v0 = vld [vmem:[#allocation2] sm:$0xff]  ;;  %v44_v1 = vld [vmem:[#allocation5] sm:$0xff]  ;;  %s57_s24 = int_to_ptr.hbm [resolvable:$true] %s56_s24 }
   0xd   :  { %s54_s21 = sshll.u32 %s157_s0, 4  ;;  %vm47_vm0 = vcmask 261120   ;;  %v43_v2 = vld [vmem:[#allocation2 + $0x8] sm:$0xff]  ;;  %v45_v3 = vadd.f32 %v44_v1, %v42_v0  ;;  %s55_s21 = int_to_ptr.vmem [resolvable:$true] %s54_s21 }
   0xe   :  { %v46_v4 = vadd.f32 %v44_v1, %v43_v2 }
   0xf   :  { %48 = vst.msk [vmem:[#allocation7] sm:$0xff] %vm47_vm0, %v45_v3 }
  0x10   :  { %49 = vst.msk [vmem:[#allocation7 + $0x8] sm:$0xff] %vm47_vm0, %v46_v4 }
  0x11   :  { %62 = dma.vmem_to_hbm [thread:$0]  %s55_s21, 256, %s57_s24, [#allocation4], %s154_s17, %s154_s17, %s155_s18  }
  0x12   :  { %151 = dma.done.wait [#allocation4], 256  }
  0x13   :  { %152 = vsyncadd [#allocation4], 4294967040 }
  0x14   :  { %67 = vsyncpa [#allocation3], 1 }
  0x15   :  { %68 = vsyncpa [#allocation6], 1 }
  0x16   :  { %69 = vsyncpa [#allocation4], 1 }

</bundles_post_ra>
